<compile_context>
chip_gen: v6e
topology: v6e:2x2x1
jax: 0.10.0
libtpu: 0.0.40
codegen_flags: <defaults>
</compile_context>

<pallas_src>
import functools

import jax
import jax.numpy as jnp
from jax.experimental import pallas as pl
from jax.experimental.pallas import tpu as pltpu

LN_EPS = 1e-5  # torch.nn.LayerNorm default


def _round_up(x, m):
    return ((x + m - 1) // m) * m


def _layer_norm(x, gamma, beta):
    mu = jnp.mean(x, axis=-1, keepdims=True)
    var = jnp.mean((x - mu) ** 2, axis=-1, keepdims=True)
    return (x - mu) * jax.lax.rsqrt(var + LN_EPS) * gamma + beta


def ffn_memory_updater_kernel(
    ts_ref, mts_ref, mem_input_ref, mem_ref, h_ref,   # row-streamed inputs
    w_all_ref, p_ref,                                  # resident packed params
    u_ref, h_out_ref,                                  # outputs
    *, dim_in, dim_time, dim_node_feat, dim_hid,
):
    f32 = jnp.float32

    # Streamed activations may be bf16; explicit upcast (v5e VPU has no bf16 math).
    mem_input = mem_input_ref[...].astype(f32)
    mem = mem_ref[...].astype(f32)
    h = h_ref[...].astype(f32)

    # dt computed in-kernel; ts / mem_ts stay f32 for time-encoding precision.
    dt = ts_ref[...] - mts_ref[...]                              # (T, 1)

    # Packed parameter rows (static slices -> cheap).
    b_upd = p_ref[0:1, :dim_hid]
    g1 = p_ref[1:2, :dim_hid]
    be1 = p_ref[2:3, :dim_hid]
    g2 = p_ref[3:4, :dim_hid]
    be2 = p_ref[4:5, :dim_hid]
    b_nf = p_ref[5:6, :dim_hid]
    w_time = p_ref[6:7, :dim_time]

    # Stacked weights (static row slices of the resident VMEM block).
    w_a = w_all_ref[0:dim_in, :]
    w_t = w_all_ref[dim_in:dim_in + dim_time, :]
    w_nf = w_all_ref[dim_in + dim_time:dim_in + dim_time + dim_node_feat, :]

    # TimeEncode: cos(dt * w), bias = 0.
    time_feat = jnp.cos(dt * w_time)                             # (T, dim_time)

    # updater Linear on the (virtual) concat [mem_input || time_feat].
    z = (
        jnp.dot(mem_input, w_a, preferred_element_type=f32)
        + jnp.dot(time_feat, w_t, preferred_element_type=f32)
        + b_upd
    )                                                            # (T, dim_hid)
    z = _layer_norm(z, g1, be1)                                  # layer_norm
    u = _layer_norm(z + mem, g2, be2)                            # layer_norm1

    # combine_node_feature (dim_node_feat > 0 and != dim_hid):
    h_out = u + jnp.dot(h, w_nf, preferred_element_type=f32) + b_nf

    u_ref[...] = u.astype(u_ref.dtype)
    h_out_ref[...] = h_out.astype(h_out_ref.dtype)


def pack_params(params):
    """One-time packing: stacked weight matrix + one (8, W) slab of 1-row params."""
    f32 = jnp.float32
    dim_hid = params["b_upd"].shape[1]
    dim_time = params["w_time"].shape[1]
    width = max(dim_hid, dim_time)

    def row(r):
        r = r.astype(f32).reshape(1, -1)
        return jnp.pad(r, ((0, 0), (0, width - r.shape[1])))

    p_packed = jnp.concatenate(
        [row(params["b_upd"]), row(params["g1"]), row(params["be1"]),
         row(params["g2"]), row(params["be2"]), row(params["b_nf"]),
         row(params["w_time"]), jnp.zeros((1, width), f32)],
        axis=0,
    )                                                            # (8, W)
    w_all = jnp.concatenate(
        [params["w_upd_a"], params["w_upd_t"], params["w_nf"]], axis=0
    ).astype(f32)                                                # (dim_in+dim_time+dim_nf, dim_hid)
    return w_all, p_packed


@functools.partial(jax.jit, static_argnames=("tile_n", "out_dtype"))
def ffn_memory_updater(ts, mem_ts, mem_input, mem, h, w_all, p_packed,
                       tile_n=2048, out_dtype=jnp.float32):
    """Returns (updated_memory, h_out); both (N, dim_hid) in `out_dtype`."""
    n = ts.shape[0]
    dim_in = mem_input.shape[1]
    dim_node_feat = h.shape[1]
    dim_hid = w_all.shape[1]
    dim_time = w_all.shape[0] - dim_in - dim_node_feat
    assert dim_time > 0, "kernel implements the dim_time > 0 path"

    ts2 = ts.reshape(n, 1).astype(jnp.float32)       # free (contiguous) reshapes
    mts2 = mem_ts.reshape(n, 1).astype(jnp.float32)

    # Tile selection: big tiles to amortize ~0.35us/grid-step overhead, but keep
    # at least ~4 grid blocks (feeds both v7x TensorCores / keeps pipeline deep);
    # always a multiple of 8 sublanes. Default 2048 stays well inside the
    # explicit 48 MiB VMEM limit on v5e/v6e/v7x.
    min_blocks = 4
    tile = min(int(tile_n), _round_up(-(-n // min_blocks), 8))
    tile = max(8, min(tile, _round_up(n, 8)))
    grid = (pl.cdiv(n, tile),)

    def row_spec(cols):
        return pl.BlockSpec((tile, cols), lambda i: (i, 0))

    def full_spec(shape):
        return pl.BlockSpec(shape, lambda i: (0, 0))

    kernel = functools.partial(
        ffn_memory_updater_kernel,
        dim_in=dim_in, dim_time=dim_time,
        dim_node_feat=dim_node_feat, dim_hid=dim_hid,
    )

    out_itemsize = jnp.dtype(out_dtype).itemsize
    flops = 2 * n * (dim_in + dim_time + dim_node_feat) * dim_hid + 16 * n * dim_hid
    bytes_accessed = (
        n * (ts2.dtype.itemsize + mts2.dtype.itemsize)
        + n * dim_in * mem_input.dtype.itemsize
        + n * dim_hid * mem.dtype.itemsize
        + n * dim_node_feat * h.dtype.itemsize
        + w_all.size * w_all.dtype.itemsize
        + p_packed.size * p_packed.dtype.itemsize
        + 2 * n * dim_hid * out_itemsize
    )
    cost = pl.CostEstimate(
        flops=int(flops),
        transcendentals=int(n * dim_time + 2 * n),
        bytes_accessed=int(bytes_accessed),
    )

    u, h_out = pl.pallas_call(
        kernel,
        out_shape=(
            jax.ShapeDtypeStruct((n, dim_hid), out_dtype),
            jax.ShapeDtypeStruct((n, dim_hid), out_dtype),
        ),
        grid_spec=pltpu.PrefetchScalarGridSpec(
            num_scalar_prefetch=0,
            grid=grid,
            in_specs=[
                row_spec(1),                 # ts
                row_spec(1),                 # mem_ts
                row_spec(dim_in),            # mem_input (bf16 ok)
                row_spec(dim_hid),           # mem       (bf16 ok)
                row_spec(dim_node_feat),     # h         (bf16 ok)
                full_spec(w_all.shape),      # stacked [W_a; W_t; W_nf]
                full_spec(p_packed.shape),   # packed biases / LN params / w_time
            ],
            out_specs=[row_spec(dim_hid), row_spec(dim_hid)],
        ),
        compiler_params=pltpu.CompilerParams(
            dimension_semantics=("parallel",),
            vmem_limit_bytes=48 * 1024 * 1024,
        ),
        cost_estimate=cost,
    )(ts2, mts2, mem_input, mem, h, w_all, p_packed)
    return u, h_out


def reference(ts, mem_ts, mem_input, mem, h, params):
    f32 = jnp.float32
    hi = jax.lax.Precision.HIGHEST
    dt = (ts - mem_ts).astype(f32).reshape(-1, 1)
    time_feat = jnp.cos(dt * params["w_time"])
    x = jnp.concatenate([mem_input.astype(f32), time_feat], axis=1)
    w_full = jnp.concatenate([params["w_upd_a"], params["w_upd_t"]], axis=0)
    z = jnp.dot(x, w_full, precision=hi) + params["b_upd"]
    z = _layer_norm(z, params["g1"], params["be1"])
    u = _layer_norm(z + mem.astype(f32), params["g2"], params["be2"])
    h_out = u + jnp.dot(h.astype(f32), params["w_nf"], precision=hi) + params["b_nf"]
    return u, h_out


def _make_inputs(key, n, dim_in, dim_hid, dim_time, dim_node_feat):
    ks = jax.random.split(key, 12)
    ts = jax.random.uniform(ks[0], (n,), jnp.float32) * 100.0
    mem_ts = ts - jax.random.uniform(ks[1], (n,), jnp.float32) * 10.0
    # Activations arrive in bf16 (streamed as-is; upcast inside the kernel).
    mem_input = jax.random.normal(ks[2], (n, dim_in), jnp.float32).astype(jnp.bfloat16)
    mem = jax.random.normal(ks[3], (n, dim_hid), jnp.float32).astype(jnp.bfloat16)
    h = jax.random.normal(ks[4], (n, dim_node_feat), jnp.float32).astype(jnp.bfloat16)

    # TimeEncode init: w = 1 / 10**linspace(0, 9, dim_time), bias = 0.
    w_time = (1.0 / (10.0 ** jnp.linspace(0.0, 9.0, dim_time))).reshape(1, dim_time)
    w_upd = jax.random.normal(ks[5], (dim_in + dim_time, dim_hid), jnp.float32) * 0.1
    params = {
        "w_time": w_time.astype(jnp.float32),
        "w_upd_a": w_upd[:dim_in],
        "w_upd_t": w_upd[dim_in:],
        "b_upd": jax.random.normal(ks[6], (1, dim_hid), jnp.float32) * 0.1,
        "g1": 1.0 + 0.1 * jax.random.normal(ks[7], (1, dim_hid), jnp.float32),
        "be1": 0.1 * jax.random.normal(ks[8], (1, dim_hid), jnp.float32),
        "g2": 1.0 + 0.1 * jax.random.normal(ks[9], (1, dim_hid), jnp.float32),
        "be2": 0.1 * jax.random.normal(ks[10], (1, dim_hid), jnp.float32),
        "w_nf": jax.random.normal(ks[11], (dim_node_feat, dim_hid), jnp.float32) * 0.1,
        "b_nf": jnp.zeros((1, dim_hid), jnp.float32),
    }
    return ts, mem_ts, mem_input, mem, h, params


if __name__ == "__main__":
    # Small, module-consistent shapes.
    DIM_IN = 32         # memory input dim
    DIM_TIME = 16       # time encoding dim
    DIM_HID = 32        # hidden / memory dim
    DIM_NODE_FEAT = 16  # node feature dim (!= DIM_HID -> node_feat_map path)

    key = jax.random.PRNGKey(0)
    k1, k2 = jax.random.split(key)

    # Case 1: tiny problem (small tile, 2 grid blocks).
    ts, mem_ts, mem_input, mem, h, params = _make_inputs(
        k1, 16, DIM_IN, DIM_HID, DIM_TIME, DIM_NODE_FEAT)
    w_all, p_packed = pack_params(params)
    upd, h_out = ffn_memory_updater(ts, mem_ts, mem_input, mem, h, w_all, p_packed)
    jax.block_until_ready((upd, h_out))
    upd_r, h_r = reference(ts, mem_ts, mem_input, mem, h, params)
    assert jnp.allclose(upd, upd_r, atol=1e-3, rtol=1e-3), "updated_memory mismatch (N=16)"
    assert jnp.allclose(h_out, h_r, atol=1e-3, rtol=1e-3), "h mismatch (N=16)"

    # Case 2: multi-block grid with a partial tail block (N not a tile multiple).
    ts, mem_ts, mem_input, mem, h, params = _make_inputs(
        k2, 1037, DIM_IN, DIM_HID, DIM_TIME, DIM_NODE_FEAT)
    w_all, p_packed = pack_params(params)
    upd, h_out = ffn_memory_updater(ts, mem_ts, mem_input, mem, h, w_all, p_packed)
    jax.block_until_ready((upd, h_out))
    upd_r, h_r = reference(ts, mem_ts, mem_input, mem, h, params)
    assert jnp.allclose(upd, upd_r, atol=1e-3, rtol=1e-3), "updated_memory mismatch (N=1037)"
    assert jnp.allclose(h_out, h_r, atol=1e-3, rtol=1e-3), "h mismatch (N=1037)"

    print("KERNEL_OK")
</pallas_src>

<mosaic_0001>
module attributes {stable_mosaic.version = 11 : i64} {
  func.func @ffn_memory_updater_kernel(%arg0: i32, %arg1: memref<8x1xf32, #tpu.memory_space<vmem>>, %arg2: memref<8x1xf32, #tpu.memory_space<vmem>>, %arg3: memref<8x32xbf16, #tpu.memory_space<vmem>>, %arg4: memref<8x32xbf16, #tpu.memory_space<vmem>>, %arg5: memref<8x16xbf16, #tpu.memory_space<vmem>>, %arg6: memref<64x32xf32, #tpu.memory_space<vmem>>, %arg7: memref<8x32xf32, #tpu.memory_space<vmem>>, %arg8: memref<8x32xf32, #tpu.memory_space<vmem>>, %arg9: memref<8x32xf32, #tpu.memory_space<vmem>>) attributes {dimension_semantics = [#tpu.dimension_semantics<parallel>], iteration_bounds = array<i64: 2>, scalar_prefetch = 0 : i64, scratch_operands = 0 : i64, tpu.core_type = #tpu.core_type<tc>, window_params = [{transform_indices = @transform_0, window_bounds = array<i64: 8, 1>}, {transform_indices = @transform_1, window_bounds = array<i64: 8, 1>}, {transform_indices = @transform_2, window_bounds = array<i64: 8, 32>}, {transform_indices = @transform_3, window_bounds = array<i64: 8, 32>}, {transform_indices = @transform_4, window_bounds = array<i64: 8, 16>}, {pipeline_mode = #tpu.pipeline_mode<synchronous>, transform_indices = @transform_5, window_bounds = array<i64: 64, 32>}, {pipeline_mode = #tpu.pipeline_mode<synchronous>, transform_indices = @transform_6, window_bounds = array<i64: 8, 32>}, {transform_indices = @transform_7, window_bounds = array<i64: 8, 32>}, {transform_indices = @transform_8, window_bounds = array<i64: 8, 32>}]} {
    %c0 = arith.constant 0 : index
    %c0_0 = arith.constant 0 : index
    %0 = vector.load %arg3[%c0, %c0_0] : memref<8x32xbf16, #tpu.memory_space<vmem>>, vector<8x32xbf16>
    %1 = arith.extf %0 : vector<8x32xbf16> to vector<8x32xf32>
    %c0_1 = arith.constant 0 : index
    %c0_2 = arith.constant 0 : index
    %2 = vector.load %arg4[%c0_1, %c0_2] : memref<8x32xbf16, #tpu.memory_space<vmem>>, vector<8x32xbf16>
    %3 = arith.extf %2 : vector<8x32xbf16> to vector<8x32xf32>
    %c0_3 = arith.constant 0 : index
    %c0_4 = arith.constant 0 : index
    %4 = vector.load %arg5[%c0_3, %c0_4] : memref<8x16xbf16, #tpu.memory_space<vmem>>, vector<8x16xbf16>
    %5 = arith.extf %4 : vector<8x16xbf16> to vector<8x16xf32>
    %c0_5 = arith.constant 0 : index
    %c0_6 = arith.constant 0 : index
    %6 = vector.load %arg1[%c0_5, %c0_6] : memref<8x1xf32, #tpu.memory_space<vmem>>, vector<8x1xf32>
    %c0_7 = arith.constant 0 : index
    %c0_8 = arith.constant 0 : index
    %7 = vector.load %arg2[%c0_7, %c0_8] : memref<8x1xf32, #tpu.memory_space<vmem>>, vector<8x1xf32>
    %8 = arith.subf %6, %7 : vector<8x1xf32>
    %c0_9 = arith.constant 0 : index
    %c0_10 = arith.constant 0 : index
    %9 = vector.load %arg7[%c0_9, %c0_10] : memref<8x32xf32, #tpu.memory_space<vmem>>, vector<1x32xf32>
    %c1 = arith.constant 1 : index
    %c0_11 = arith.constant 0 : index
    %10 = vector.load %arg7[%c1, %c0_11] : memref<8x32xf32, #tpu.memory_space<vmem>>, vector<1x32xf32>
    %c2 = arith.constant 2 : index
    %c0_12 = arith.constant 0 : index
    %11 = vector.load %arg7[%c2, %c0_12] : memref<8x32xf32, #tpu.memory_space<vmem>>, vector<1x32xf32>
    %c3 = arith.constant 3 : index
    %c0_13 = arith.constant 0 : index
    %12 = vector.load %arg7[%c3, %c0_13] : memref<8x32xf32, #tpu.memory_space<vmem>>, vector<1x32xf32>
    %c4 = arith.constant 4 : index
    %c0_14 = arith.constant 0 : index
    %13 = vector.load %arg7[%c4, %c0_14] : memref<8x32xf32, #tpu.memory_space<vmem>>, vector<1x32xf32>
    %c5 = arith.constant 5 : index
    %c0_15 = arith.constant 0 : index
    %14 = vector.load %arg7[%c5, %c0_15] : memref<8x32xf32, #tpu.memory_space<vmem>>, vector<1x32xf32>
    %c6 = arith.constant 6 : index
    %c0_16 = arith.constant 0 : index
    %15 = vector.load %arg7[%c6, %c0_16] : memref<8x32xf32, #tpu.memory_space<vmem>>, vector<1x16xf32>
    %c0_17 = arith.constant 0 : index
    %c0_18 = arith.constant 0 : index
    %16 = vector.load %arg6[%c0_17, %c0_18] : memref<64x32xf32, #tpu.memory_space<vmem>>, vector<32x32xf32>
    %c32 = arith.constant 32 : index
    %c0_19 = arith.constant 0 : index
    %17 = vector.load %arg6[%c32, %c0_19] : memref<64x32xf32, #tpu.memory_space<vmem>>, vector<16x32xf32>
    %c48 = arith.constant 48 : index
    %c0_20 = arith.constant 0 : index
    %18 = vector.load %arg6[%c48, %c0_20] : memref<64x32xf32, #tpu.memory_space<vmem>>, vector<16x32xf32>
    %19 = vector.broadcast %8 : vector<8x1xf32> to vector<8x16xf32>
    %20 = vector.broadcast %15 : vector<1x16xf32> to vector<8x16xf32>
    %21 = arith.mulf %19, %20 : vector<8x16xf32>
    %22 = math.cos %21 : vector<8x16xf32>
    %cst = arith.constant dense<0.000000e+00> : vector<8x32xf32>
    %23 = tpu.matmul %1, %16, %cst {dimension_numbers = #tpu.dot_dimension_numbers<[1], [0], [0], [1], [0, 0, 1, 1], [], []>} : vector<8x32xf32>, vector<32x32xf32>, vector<8x32xf32> -> vector<8x32xf32>
    %cst_21 = arith.constant dense<0.000000e+00> : vector<8x32xf32>
    %24 = tpu.matmul %22, %17, %cst_21 {dimension_numbers = #tpu.dot_dimension_numbers<[1], [0], [0], [1], [0, 0, 1, 1], [], []>} : vector<8x16xf32>, vector<16x32xf32>, vector<8x32xf32> -> vector<8x32xf32>
    %25 = arith.addf %23, %24 : vector<8x32xf32>
    %26 = vector.broadcast %9 : vector<1x32xf32> to vector<8x32xf32>
    %27 = arith.addf %25, %26 : vector<8x32xf32>
    %cst_22 = arith.constant dense<0.000000e+00> : vector<8xf32>
    %28 = vector.multi_reduction <add>, %27, %cst_22 [1] : vector<8x32xf32> to vector<8xf32>
    %29 = vector.shape_cast %28 : vector<8xf32> to vector<8x1xf32>
    %cst_23 = arith.constant 3.200000e+01 : f32
    %30 = vector.broadcast %cst_23 : f32 to vector<8x1xf32>
    %31 = arith.divf %29, %30 : vector<8x1xf32>
    %32 = vector.broadcast %31 : vector<8x1xf32> to vector<8x32xf32>
    %33 = arith.subf %27, %32 : vector<8x32xf32>
    %34 = arith.mulf %33, %33 : vector<8x32xf32>
    %cst_24 = arith.constant dense<0.000000e+00> : vector<8xf32>
    %35 = vector.multi_reduction <add>, %34, %cst_24 [1] : vector<8x32xf32> to vector<8xf32>
    %36 = vector.shape_cast %35 : vector<8xf32> to vector<8x1xf32>
    %cst_25 = arith.constant 3.200000e+01 : f32
    %37 = vector.broadcast %cst_25 : f32 to vector<8x1xf32>
    %38 = arith.divf %36, %37 : vector<8x1xf32>
    %39 = vector.broadcast %31 : vector<8x1xf32> to vector<8x32xf32>
    %40 = arith.subf %27, %39 : vector<8x32xf32>
    %cst_26 = arith.constant 9.99999974E-6 : f32
    %41 = vector.broadcast %cst_26 : f32 to vector<8x1xf32>
    %42 = arith.addf %38, %41 : vector<8x1xf32>
    %43 = math.rsqrt %42 : vector<8x1xf32>
    %44 = vector.broadcast %43 : vector<8x1xf32> to vector<8x32xf32>
    %45 = arith.mulf %40, %44 : vector<8x32xf32>
    %46 = vector.broadcast %10 : vector<1x32xf32> to vector<8x32xf32>
    %47 = arith.mulf %45, %46 : vector<8x32xf32>
    %48 = vector.broadcast %11 : vector<1x32xf32> to vector<8x32xf32>
    %49 = arith.addf %47, %48 : vector<8x32xf32>
    %50 = arith.addf %49, %3 : vector<8x32xf32>
    %cst_27 = arith.constant dense<0.000000e+00> : vector<8xf32>
    %51 = vector.multi_reduction <add>, %50, %cst_27 [1] : vector<8x32xf32> to vector<8xf32>
    %52 = vector.shape_cast %51 : vector<8xf32> to vector<8x1xf32>
    %cst_28 = arith.constant 3.200000e+01 : f32
    %53 = vector.broadcast %cst_28 : f32 to vector<8x1xf32>
    %54 = arith.divf %52, %53 : vector<8x1xf32>
    %55 = vector.broadcast %54 : vector<8x1xf32> to vector<8x32xf32>
    %56 = arith.subf %50, %55 : vector<8x32xf32>
    %57 = arith.mulf %56, %56 : vector<8x32xf32>
    %cst_29 = arith.constant dense<0.000000e+00> : vector<8xf32>
    %58 = vector.multi_reduction <add>, %57, %cst_29 [1] : vector<8x32xf32> to vector<8xf32>
    %59 = vector.shape_cast %58 : vector<8xf32> to vector<8x1xf32>
    %cst_30 = arith.constant 3.200000e+01 : f32
    %60 = vector.broadcast %cst_30 : f32 to vector<8x1xf32>
    %61 = arith.divf %59, %60 : vector<8x1xf32>
    %62 = vector.broadcast %54 : vector<8x1xf32> to vector<8x32xf32>
    %63 = arith.subf %50, %62 : vector<8x32xf32>
    %cst_31 = arith.constant 9.99999974E-6 : f32
    %64 = vector.broadcast %cst_31 : f32 to vector<8x1xf32>
    %65 = arith.addf %61, %64 : vector<8x1xf32>
    %66 = math.rsqrt %65 : vector<8x1xf32>
    %67 = vector.broadcast %66 : vector<8x1xf32> to vector<8x32xf32>
    %68 = arith.mulf %63, %67 : vector<8x32xf32>
    %69 = vector.broadcast %12 : vector<1x32xf32> to vector<8x32xf32>
    %70 = arith.mulf %68, %69 : vector<8x32xf32>
    %71 = vector.broadcast %13 : vector<1x32xf32> to vector<8x32xf32>
    %72 = arith.addf %70, %71 : vector<8x32xf32>
    %cst_32 = arith.constant dense<0.000000e+00> : vector<8x32xf32>
    %73 = tpu.matmul %5, %18, %cst_32 {dimension_numbers = #tpu.dot_dimension_numbers<[1], [0], [0], [1], [0, 0, 1, 1], [], []>} : vector<8x16xf32>, vector<16x32xf32>, vector<8x32xf32> -> vector<8x32xf32>
    %74 = arith.addf %72, %73 : vector<8x32xf32>
    %75 = vector.broadcast %14 : vector<1x32xf32> to vector<8x32xf32>
    %76 = arith.addf %74, %75 : vector<8x32xf32>
    %c0_33 = arith.constant 0 : index
    %c0_34 = arith.constant 0 : index
    %77 = vector.load %arg8[%c0_33, %c0_34] : memref<8x32xf32, #tpu.memory_space<vmem>>, vector<8x32xf32>
    tpu.vector_store %arg8[%c0_33, %c0_34], %72 {strides = array<i32>} : memref<8x32xf32, #tpu.memory_space<vmem>>, vector<8x32xf32>,
    %c0_35 = arith.constant 0 : index
    %c0_36 = arith.constant 0 : index
    %78 = vector.load %arg9[%c0_35, %c0_36] : memref<8x32xf32, #tpu.memory_space<vmem>>, vector<8x32xf32>
    tpu.vector_store %arg9[%c0_35, %c0_36], %76 {strides = array<i32>} : memref<8x32xf32, #tpu.memory_space<vmem>>, vector<8x32xf32>,
    return
  }
  func.func @transform_0(%arg0: i32) -> (i32, i32) {
    %c0_i32 = arith.constant 0 : i32
    %c0_i32_0 = arith.constant 0 : i32
    return %arg0, %c0_i32 : i32, i32
  }
  func.func @transform_1(%arg0: i32) -> (i32, i32) {
    %c0_i32 = arith.constant 0 : i32
    %c0_i32_0 = arith.constant 0 : i32
    return %arg0, %c0_i32 : i32, i32
  }
  func.func @transform_2(%arg0: i32) -> (i32, i32) {
    %c0_i32 = arith.constant 0 : i32
    %c0_i32_0 = arith.constant 0 : i32
    return %arg0, %c0_i32 : i32, i32
  }
  func.func @transform_3(%arg0: i32) -> (i32, i32) {
    %c0_i32 = arith.constant 0 : i32
    %c0_i32_0 = arith.constant 0 : i32
    return %arg0, %c0_i32 : i32, i32
  }
  func.func @transform_4(%arg0: i32) -> (i32, i32) {
    %c0_i32 = arith.constant 0 : i32
    %c0_i32_0 = arith.constant 0 : i32
    return %arg0, %c0_i32 : i32, i32
  }
  func.func @transform_5(%arg0: i32) -> (i32, i32) {
    %c0_i32 = arith.constant 0 : i32
    %c0_i32_0 = arith.constant 0 : i32
    %c0_i32_1 = arith.constant 0 : i32
    return %c0_i32, %c0_i32_0 : i32, i32
  }
  func.func @transform_6(%arg0: i32) -> (i32, i32) {
    %c0_i32 = arith.constant 0 : i32
    %c0_i32_0 = arith.constant 0 : i32
    %c0_i32_1 = arith.constant 0 : i32
    return %c0_i32, %c0_i32_0 : i32, i32
  }
  func.func @transform_7(%arg0: i32) -> (i32, i32) {
    %c0_i32 = arith.constant 0 : i32
    %c0_i32_0 = arith.constant 0 : i32
    return %arg0, %c0_i32 : i32, i32
  }
  func.func @transform_8(%arg0: i32) -> (i32, i32) {
    %c0_i32 = arith.constant 0 : i32
    %c0_i32_0 = arith.constant 0 : i32
    return %arg0, %c0_i32 : i32, i32
  }
}

</mosaic_0001>

<bundles_post_ra>
// kernel: ffn_memory_updater.1
= control target key start
LH: loop header
LB: loop body
LE: loop exit
PB: predicated region body
PF: predicated region fallthrough
CT: control target
= control target key end

     0   :  { %s1486_s0 = inlined_call_operand.vmem [shape: f32[16,1], index: 0, kind: input, shape index: {}]   ;;  %s1487_s1 = inlined_call_operand.vmem [shape: f32[16,1], index: 1, kind: input, shape index: {}]   ;;  %s1488_s2 = inlined_call_operand.vmem [shape: bf16[16,32], index: 2, kind: input, shape index: {}]   ;;  %s1489_s3 = inlined_call_operand.vmem [shape: bf16[16,32], index: 3, kind: input, shape index: {}]   ;;  %s1490_s4 = inlined_call_operand.vmem [shape: bf16[16,16], index: 4, kind: input, shape index: {}]   ;;  %s1491_s5 = inlined_call_operand.vmem [shape: f32[64,32], index: 5, kind: input, shape index: {}]   ;;  %s1492_s6 = inlined_call_operand.vmem [shape: f32[8,32], index: 6, kind: input, shape index: {}]   ;;  %s1493_s7 = inlined_call_operand.hbm [shape: f32[16,32], index: 7, kind: output, shape index: {0}]   ;;  %s1494_s8 = inlined_call_operand.hbm [shape: f32[16,32], index: 8, kind: output, shape index: {1}]  }
   0x1   :  { %1496 = sst [smem:[#allocation8_spill]] %s1486_s0 }
   0x2   :  { %14 = vsyncpa [#allocation3], 0 }
   0x3   :  { %16 = vsyncpa [#allocation3 + $0x1], 0 }
   0x4   :  { %17 = vsyncpa [#allocation5], 0 }
   0x5   :  { %19 = vsyncpa [#allocation5 + $0x1], 0  ;;  %s1251_s27 = smov 0   ;;  %s1253_s28 = smov 0  }
   0x6   :  { %s1255_s29 = smov 0   ;;  %s1257_s30 = smov 0  }
   0x7 LB: > { %s1272_s9 = sadd.s32 4294967295, %s1193_s30   ;;  %s970_s10 = sadd.s32 4294967294, %s1193_s30   ;;  %s1193_s30 = sphi %s1257_s30, %s1505_s30   ;;  %s1189_s29 = sphi %s1255_s29, %s1504_s29   ;;  %s1185_s28 = sphi %s1253_s28, %s1503_s28   ;;  %s1181_s27 = sphi %s1251_s27, %s1502_s27  }
   0x8   : > { %s1276_s11 = sadd.s32 1, %s1193_s30   ;;  %s204_s12 = sadd.s32 1, %s1189_s29 }
   0x9   : > { %s201_s13 = ssub.s32 %s1193_s30, %s1276_s11  ;;  %p214_p0 = scmp.ne.s32.totalorder %s1189_s29, %s1185_s28 }
   0xa   : > { %p202_p1 = scmp.eq.s32.totalorder %s201_s13, 0  ;;  %p215_p2 = scmp.eq.s32.totalorder %s1272_s9, 1 }
   0xb   : > { %p220_p3 = scmp.ne.s32.totalorder %s1185_s28, %s1181_s27  ;;  %p221_p4 = scmp.eq.s32.totalorder %s970_s10, 1 }
   0xc   : > { %s1287_s14 = scalar_select %p202_p1, %s1189_s29, %s204_s12  }
   0xd   : > { %p1289_p5 = por %p215_p2, %p214_p0  ;;  %p1293_p6 = por %p221_p4, %p220_p3 }
   0xe   : > { %p973_p7 = scmp.ge.s32.totalorder %s1193_s30, 1  ;;  %p306_p8 = scmp.lt.s32.totalorder %s1193_s30, 3 }
  0x10   : > { %p307_p9 = pnand %p973_p7, %p306_p8 }
  0x11   : > { %p360_p10 = scmp.lt.s32.totalorder (!%p307_p9), %s1272_s9, 1  ;;  %s1499_s0 = sld [smem:[#allocation8_spill]] (!%p307_p9) }
  0x12   : > { %310 = sbr.rel (%p307_p9) target bundleno = 1090 (0x442), region = 48  ;;  %s1495_s12 = sshll.u32 (!%p307_p9), %s1272_s9, 7 }
  0x17   : > { %v1195_v0 = vmov 0   ;;  %s361_s17 = scalar_select %p360_p10, %s1272_s9, 1  ;;  %v399_v4 = vld [vmem:[%s1491_s5 + $0x18] sm:$0xff]  ;;  %v1196_v5 = vmov 0.0   ;;  %v398_v6 = vld [vmem:[%s1491_s5 + $0x10] sm:$0xff]  ;;  %v401_v7 = vld [vmem:[%s1491_s5 + $0x28] sm:$0xff] }
  0x18   : > { %1094 = vset.pattern.permute.xlu0 %v1195_v0  ;;  %1019 = vmatprep.subr.mxu1 %v1196_v5  ;;  %v400_v9 = vld [vmem:[%s1491_s5 + $0x20] sm:$0xff]  ;;  %v397_v10 = vld [vmem:[%s1491_s5 + $0x8] sm:$0xff]  ;;  %vm1197_vm0 = vmmov 0   ;;  %vm591_vm1 = vcmask 261120   ;;  %v1198_v26 = vmov 683565275  }
  0x19   : > { %s976_s18 = sshll.u32 %s361_s17, 3  ;;  %s1307_s25 = sshll.u32 %s361_s17, 2  ;;  %1012 = vmatprep.subr.mxu0 %v1196_v5  ;;  %1020 = vmatpush3.msra.mxu1 %v399_v4  ;;  %v396_v11 = vld [vmem:[%s1491_s5] sm:$0xff]  ;;  %v1199_v28 = vmov 2475754826   ;;  %vm517_vm14 = vcmask 130048  }
  0x1a   : > { %s363_s21 = scalar_lea.vmem %s1499_s0, %s976_s18  ;;  %s367_s24 = scalar_lea.vmem %s1487_s1, %s976_s18  ;;  %1013 = vmatpush3.msra.mxu0 %v401_v7  ;;  %1021 = vmatprep.subr.mxu1 %v1196_v5  ;;  %v981_v13 = vld [vmem:[%s1492_s6 + $0x6] ss:$0 sm:$0xff]  ;;  %v1200_v31 = vmov 2131351028   ;;  %v1201_v34 = vmov 2102212464  }
  0x1b   : > { %v386_v1 = vld [vmem:[%s363_s21] sm:$0xff]  ;;  %s371_s19 = scalar_lea.vmem %s1488_s2, %s1307_s25  ;;  %1027 = vmatprep.mubr.msk.f32.mxu1 %vm1197_vm0, %v1196_v5  ;;  %1022 = vmatpush3.msra.mxu1 %v398_v6  ;;  %v1202_v37 = vmov 920167782   ;;  %v1203_v40 = vmov 1326507024   ;;  %s379_s22 = scalar_lea.vmem %s1490_s4, %s1307_s25 }
  0x1c   : > { %v387_v2 = vld [vmem:[%s367_s24] sm:$0xff]  ;;  %1014 = vmatprep.subr.mxu0 %v1196_v5  ;;  %1023 = vmatprep.subr.mxu1 %v1196_v5  ;;  %s1415_s17 = scalar_lea.hbm %s1493_s7, %s1495_s12  ;;  %s1204_s18 = smov [#allocation2]  }
  0x1d   : > { %v388_v3 = vsub.f32 %v386_v1, %v387_v2  ;;  %v380_v8 = vld [vmem:[%s371_s19] sm:$0xf]  ;;  %1015 = vmatpush3.msra.mxu0 %v400_v9  ;;  %1024 = vmatpush3.msra.mxu1 %v397_v10  ;;  %s375_s19 = scalar_lea.vmem %s1489_s3, %s1307_s25  ;;  %s1400_s25 = sand.u32 1, %s1185_s28  }
  0x1e   : > { %v381_v12 = vunpack.c.l.bf16 %v380_v8  ;;  %1016 = vmatprep.mubr.msk.f32.mxu0 %vm1197_vm0, %v1196_v5  ;;  %1025 = vmatprep.subr.mxu1 %v1196_v5  ;;  %s800_s10 = scalar_lea.sflag [#allocation3], %s1400_s25  ;;  %s1107_s12 = sshll.u32 %s1204_s18, 4  ;;  %s1108_s12 = int_to_ptr.vmem [resolvable:$false] %s1107_s12 }
  0x1f   : > { %406 = vperm.xlu0 %1094, %v388_v3   ;;  %1030 = vmatprep.subr.mxu0 %v1196_v5  ;;  %s1109_s21 = scalar_lea.vmem %s1108_s12, 256 }
  0x20   : > { %1026 = vmatpush3.msra.mxu1 %v396_v11 }
  0x21   : > { %1028 = vmatmul.mubr.msk.f32.vlgmr.msra.gmra.mxu1 %vm591_vm1, %v381_v12 }
  0x9a   : > { %v407_v14 = vpop.permute.xlu0 %406 }
  0x9b   : > { %v1346_v15 = vmul.f32 %v981_v13, %v407_v14 }
  0x9d   : > { %v417_v16 = vand.u32 2139095040, %v1346_v15  ;;  %v414_v20 = vand.u32 2147483647, %v1346_v15  ;;  %vm416_vm9 = vcmp.lt.s32.totalorder %v1346_v15, 0  ;;  %vm506_vm15 = vweird.f32 %v1346_v15 }
  0x9f   : > { %v418_v17 = vshrl.u32 %v417_v16, 23  ;;  %v421_v23 = vand.u32 8388607, %v414_v20  ;;  %vm415_vm10 = vcmp.le.f32.partialorder %v414_v20, 0.7853982 }
  0xa1   : > { %v982_v18 = vadd.s32 4294967169, %v418_v17  ;;  %v422_v42 = vor.u32 8388608, %v421_v23 }
  0xa3   : > { %v424_v19 = vadd.s32 1, %v982_v18  ;;  %v462_v56 = vshll.u32 %v422_v42, 8 }
  0xa5   : > { %vm425_vm2 = vcmp.gt.s32.totalorder %v424_v19, 0 }
  0xa6   : > { %v426_v21 = vsel %vm425_vm2, %v424_v19, 0 }
  0xa7   : > { %v428_v22 = vand.u32 31, %v426_v21  ;;  %v427_v25 = vshrl.u32 %v426_v21, 5 }
  0xa9   : > { %v429_v24 = vsub.s32 32, %v428_v22  ;;  %v431_v27 = vshll.u32 %v1198_v26, %v428_v22  ;;  %v434_v29 = vshll.u32 %v1199_v28, %v428_v22  ;;  %v437_v33 = vshll.u32 %v1200_v31, %v428_v22 }
  0xaa   : > { %v440_v36 = vshll.u32 %v1201_v34, %v428_v22  ;;  %v443_v39 = vshll.u32 %v1202_v37, %v428_v22  ;;  %vm446_vm3 = vcmp.lt.s32.totalorder %v427_v25, 1  ;;  %vm449_vm4 = vcmp.lt.s32.totalorder %v427_v25, 4 }
  0xab   : > { %v432_v30 = vshrl.u32 %v1199_v28, %v429_v24  ;;  %v435_v32 = vshrl.u32 %v1200_v31, %v429_v24  ;;  %v438_v35 = vshrl.u32 %v1201_v34, %v429_v24  ;;  %v441_v38 = vshrl.u32 %v1202_v37, %v429_v24 }
  0xac   : > { %v444_v41 = vshrl.u32 %v1203_v40, %v429_v24  ;;  %v430_v51 = vshrl.u32 %v1198_v26, %v429_v24  ;;  %vm448_vm5 = vcmp.lt.s32.totalorder %v427_v25, 3  ;;  %vm447_vm6 = vcmp.lt.s32.totalorder %v427_v25, 2 }
  0xad   : > { %v433_v43 = vor.u32 %v432_v30, %v431_v27  ;;  %v436_v44 = vor.u32 %v435_v32, %v434_v29  ;;  %v439_v45 = vor.u32 %v438_v35, %v437_v33  ;;  %v442_v46 = vor.u32 %v441_v38, %v440_v36 }
  0xae   : > { %v445_v47 = vor.u32 %v444_v41, %v443_v39 }
  0xaf   : > { %v451_v48 = vsel %vm449_vm4, %v439_v45, 2102212464  ;;  %v454_v49 = vsel %vm446_vm3, %v433_v43, %v436_v44  ;;  %v458_v50 = vsel %vm446_vm3, %v436_v44, %v439_v45  ;;  %v455_v52 = vsel %vm449_vm4, %v442_v46, 920167782 }
  0xb0   : > { %v459_v53 = vsel %vm449_vm4, %v445_v47, 1326507024  ;;  %v456_v54 = vsel %vm448_vm5, %v439_v45, %v455_v52  ;;  %v450_v57 = vsel %vm446_vm3, %v430_v51, %v433_v43  ;;  %v452_v58 = vsel %vm448_vm5, %v436_v44, %v451_v48  ;;  %v988_v47 = vld [vmem:[%s1492_s6] ss:$0 sm:$0xff] }
  0xb1   : > { %v460_v55 = vsel %vm448_vm5, %v442_v46, %v459_v53  ;;  %v457_v59 = vsel %vm447_vm6, %v454_v49, %v456_v54  ;;  %v453_v1 = vsel %vm447_vm6, %v450_v57, %v452_v58  ;;  %v403_v58 = vld [vmem:[%s1491_s5 + $0x38] sm:$0xff] }
  0xb2   : > { %v461_v60 = vsel %vm447_vm6, %v458_v50, %v460_v55  ;;  %v1355_v63 = vmul.u32.u64.low %v462_v56, %v457_v59  ;;  %v1356_v0 = vmul.u32.u64.high %v462_v56, %v457_v59, %v1355_v63  ;;  %v469_v3 = vmul.u32 %v462_v56, %v453_v1  ;;  %v402_v59 = vld [vmem:[%s1491_s5 + $0x30] sm:$0xff]  ;;  %v989_v1 = vld [vmem:[%s1492_s6 + $0x1] ss:$0 sm:$0xff] }
  0xb3   : > { %v1352_v61 = vmul.u32.u64.low %v462_v56, %v461_v60  ;;  %v1353_v62 = vmul.u32.u64.high %v462_v56, %v461_v60, %v1352_v61  ;;  %v384_v56 = vld [vmem:[%s379_s22] sm:$0xf]  ;;  %s974_s22 = sshll.u32 %s1400_s25, 3 }
  0xb4   : > { %v472_v2 = vadd.s32 1, %v1356_v0  ;;  %v385_v57 = vunpack.c.l.bf16 %v384_v56  ;;  %s352_s13 = scalar_lea.vmem [#allocation2], %s974_s22  ;;  %s1422_s24 = scalar_lea.vmem [#allocation4], %s974_s22 }
  0xb5   : > { %vm471_vm7 = vc.u32 %v1353_v62, %v1355_v63  ;;  %v470_v17 = vadd.s32 %v1355_v63, %v1353_v62 }
  0xb6   : > { %v473_v4 = vsel %vm471_vm7, %v472_v2, %v1356_v0  ;;  %v382_v0 = vld [vmem:[%s375_s19] sm:$0xf]  ;;  %s818_s19 = sshll.u32 %s352_s13, 4  ;;  %s1417_s19 = int_to_ptr.vmem [resolvable:$true] %s818_s19 }
  0xb7   : > { %v474_v6 = vadd.s32 %v473_v4, %v469_v3  ;;  %v383_v3 = vunpack.c.l.bf16 %v382_v0  ;;  %s1103_s20 = scalar_lea.vmem %s1417_s19, 128  ;;  %p1110_p0 = scmp.lt.s32.totalorder %s1417_s19, %s1108_s12 }
  0xb8   : > { %p1104_p11 = scmp.ne.s32.totalorder %s1417_s19, %s1103_s20  ;;  %p1111_p1 = scmp.lt.s32.totalorder %s1109_s21, %s1103_s20 }
  0xb9   : > { %v475_v7 = vadd.s32 536870912, %v474_v6 }
  0xba   : > { %p1105_p12 = pnand %p1104_p11, %p1289_p5  ;;  %p1112_p2 = por %p1111_p1, %p1110_p0 }
  0xbb   : > { %v476_v8 = vshrl.u32 %v475_v7, 30 }
  0xbc   : > { %p1106_p13 = pneg %p1105_p12 }
  0xbd   : > { %v477_v9 = vshll.u32 %v476_v8, 30  ;;  %v500_v33 = vsub.s32 4, %v476_v8 }
  0xbe   : > { %p1113_p3 = pnand %p1112_p2, %p1106_p13 }
  0xbf   : > { %v478_v10 = vsub.s32 %v474_v6, %v477_v9  ;;  %v501_v34 = vsel %vm416_vm9, %v500_v33, %v476_v8 }
  0xc0   : > { %v503_v35 = vsel %vm415_vm10, 0, %v501_v34 }
  0xc1   : > { %v480_v11 = vsub.s32 0, %v478_v10  ;;  %v507_v36 = vand.u32 3, %v503_v35 }
  0xc3   : > { %v983_v12 = vmin.u32 %v480_v11, %v478_v10  ;;  %vm512_vm11 = vcmp.eq.s32.totalorder %v507_v36, 2  ;;  %vm509_vm12 = vcmp.eq.s32.totalorder %v507_v36, 0  ;;  %vm508_vm13 = vcmp.lt.s32.totalorder %v507_v36, 2 }
  0xc5   : > { %v482_v13 = vclz %v983_v12 }
  0xc7   : > { %v984_v14 = vadd.s32 4294967294, %v482_v13 }
  0xc9   : > { %vm985_vm8 = vcmp.lt.s32.totalorder %v984_v14, 0 }
  0xca   : > { %v485_v16 = vsel %vm985_vm8, 0, %v984_v14 }
  0xcb   : > { %v486_v18 = vsub.s32 32, %v485_v16  ;;  %v490_v19 = vsub.s32 4294967266, %v485_v16  ;;  %v487_v21 = vshll.u32 %v478_v10, %v485_v16 }
  0xcd   : > { %v488_v22 = vshrl.u32 %v470_v17, %v486_v18  ;;  %v491_v23 = vadd.s32 127, %v490_v19 }
  0xcf   : > { %v489_v24 = vor.u32 %v488_v22, %v487_v21  ;;  %v492_v25 = vshll.u32 %v491_v23, 23  ;;  %v991_v22 = vld [vmem:[%s1492_s6 + $0x3] ss:$0 sm:$0xff] }
  0xd1   : > { %v493_v26 = vor.u32 4788187, %v492_v25  ;;  %v496_v28 = vcvt.s32.f32 %v489_v24  ;;  %v992_v24 = vld [vmem:[%s1492_s6 + $0x4] ss:$0 sm:$0xff] }
  0xd3   : > { %v494_v27 = vand.u32 2147483647, %v493_v26 }
  0xd5   : > { %v497_v29 = vmul.f32 %v496_v28, %v494_v27  ;;  %v994_v27 = vld [vmem:[%s1492_s6 + $0x5] ss:$0 sm:$0xff] }
  0xd7   : > { %v498_v30 = vxor.u32 2147483648, %v497_v29 }
  0xd9   : > { %v499_v31 = vsel %vm416_vm9, %v498_v30, %v497_v29 }
  0xda   : > { %v502_v32 = vsel %vm415_vm10, %v1346_v15, %v499_v31 }
  0xdb   : > { %1095 = vcosq.f32 %v502_v32 }
  0xdc   : > { %1097 = vsinq.f32 %v502_v32 }
  0xe1   : > { %v661_v44 = vpop.f32.mrf.mxu1 }
  0xe3   : > { %v1029_v45 = vpop.f32.mrf.mxu1 }
  0xe8   : > { %v1096_v37 = vpop.eup %1095 }
  0xe9   : > { %v1098_v38 = vpop.eup %1097  ;;  %v513_v39 = vxor.u32 2147483648, %v1096_v37 }
  0xea   : > { %v510_v40 = vxor.u32 2147483648, %v1098_v38 }
  0xeb   : > { %v514_v41 = vsel %vm512_vm11, %v513_v39, %v1098_v38 }
  0xec   : > { %v511_v42 = vsel %vm509_vm12, %v1096_v37, %v510_v40 }
  0xed   : > { %v515_v20 = vsel %vm508_vm13, %v511_v42, %v514_v41 }
  0xee   : > { %v516_v43 = vsel %vm506_vm15, nan, %v515_v20 }
  0xef   : > { %1017 = vmatmul.mubr.msk.f32.vlgmr.msra.gmra.mxu0 %vm517_vm14, %v516_v43 }
  0xf0   : > { %1034 = vmatprep.mubr.msk.f32.mxu0 %vm1197_vm0, %v1196_v5  ;;  %1031 = vmatpush3.msra.mxu0 %v403_v58 }
  0xf1   : > { %1032 = vmatprep.subr.mxu0 %v1196_v5  ;;  %v990_v5 = vld [vmem:[%s1492_s6 + $0x2] ss:$0 sm:$0xff] }
  0xf2   : > { %1033 = vmatpush3.msra.mxu0 %v402_v59 }
  0xf3   : > { %1035 = vmatmul.mubr.msk.f32.vlgmr.msra.gmra.mxu0 %vm517_vm14, %v385_v57 }
 0x1af   : > { %v587_v46 = vpop.f32.mrf.mxu0 }
 0x1b0   : > { %v662_v48 = vadd.f32 %v661_v44, %v587_v46 }
 0x1b1   : > { %v1018_v49 = vpop.f32.mrf.mxu0 }
 0x1b2   : > { %v669_v50 = vadd.f32 %v988_v47, %v662_v48 }
 0x1b3   : > { %v787_v14 = vpop.f32.mrf.mxu0 }
 0x1b4   : > { %v670_v15 = vsel %vm591_vm1, %v669_v50, 0.0 }
 0x1b5   : > { %671 = vadd.xlane.f32.xlu0 %v670_v15  ;;  %v1036_v16 = vpop.f32.mrf.mxu0 }
 0x23e   : > { %v672_v51 = vpop.xlane.xlu0 %671 }
 0x23f   : > { %v674_v52 = vmul.f32 0.03125, %v672_v51 }
 0x241   : > { %v675_v53 = vsub.f32 %v669_v50, %v674_v52 }
 0x243   : > { %v676_v54 = vmul.f32 %v675_v53, %v675_v53 }
 0x245   : > { %v677_v55 = vsel %vm591_vm1, %v676_v54, 0.0 }
 0x246   : > { %678 = vadd.xlane.f32.xlu1 %v677_v55 }
 0x2cf   : > { %v679_v60 = vpop.xlane.xlu1 %678 }
 0x2d0   : > { %v680_v61 = vmul.f32 0.03125, %v679_v60 }
 0x2d2   : > { %v681_v62 = vadd.f32 1e-05, %v680_v61 }
 0x2d4   : > { %1099 = vrsqrt.f32 %v681_v62 }
 0x2e1   : > { %v1100_v63 = vpop.eup %1099 }
 0x2e2   : > { %v683_v2 = vmul.f32 %v1100_v63, %v675_v53 }
 0x2e4   : > { %v688_v4 = vmul.f32 %v989_v1, %v683_v2 }
 0x2e6   : > { %v693_v6 = vadd.f32 %v990_v5, %v688_v4 }
 0x2e8   : > { %v694_v7 = vadd.f32 %v693_v6, %v383_v3 }
 0x2ea   : > { %v695_v8 = vsel %vm591_vm1, %v694_v7, 0.0 }
 0x2eb   : > { %696 = vadd.xlane.f32.xlu1 %v695_v8 }
 0x374   : > { %v697_v9 = vpop.xlane.xlu1 %696 }
 0x375   : > { %v698_v10 = vmul.f32 0.03125, %v697_v9 }
 0x377   : > { %v699_v11 = vsub.f32 %v694_v7, %v698_v10 }
 0x379   : > { %v700_v12 = vmul.f32 %v699_v11, %v699_v11 }
 0x37b   : > { %v701_v13 = vsel %vm591_vm1, %v700_v12, 0.0 }
 0x37c   : > { %702 = vadd.xlane.f32.xlu1 %v701_v13 }
 0x405   : > { %v703_v17 = vpop.xlane.xlu1 %702 }
 0x406   : > { %v704_v18 = vmul.f32 0.03125, %v703_v17 }
 0x408   : > { %v705_v19 = vadd.f32 1e-05, %v704_v18 }
 0x40a   : > { %1101 = vrsqrt.f32 %v705_v19 }
 0x417   : > { %v1102_v21 = vpop.eup %1101 }
 0x418   : > { %v707_v23 = vmul.f32 %v1102_v21, %v699_v11 }
 0x41a   : > { %v712_v25 = vmul.f32 %v991_v22, %v707_v23 }
 0x41c   : > { %v717_v26 = vadd.f32 %v992_v24, %v712_v25 }
 0x41e   : > { %v791_v28 = vadd.f32 %v787_v14, %v717_v26  ;;  %797 = vst.msk [vmem:[%s352_s13] sm:$0xff] %vm591_vm1, %v717_v26 }
 0x41f   : > { %1116 = shalt.err (!%p1113_p3)
}
 0x420   : > { %s1117_s22 = scalar_lea.hbm %s1415_s17, 128  ;;  %s1121_s18 = scalar_lea.hbm %s1493_s7, 256 }
 0x421   : > { %p1118_p4 = scmp.ne.s32.totalorder %s1415_s17, %s1117_s22  ;;  %p1122_p9 = scmp.lt.s32.totalorder %s1415_s17, %s1493_s7 }
 0x422   : > { %p1123_p10 = scmp.lt.s32.totalorder %s1121_s18, %s1117_s22 }
 0x423   : > { %p1119_p7 = pnand %p1118_p4, %p1289_p5 }
 0x424   : > { %p1124_p11 = por %p1123_p10, %p1122_p9 }
 0x425   : > { %p1120_p8 = pneg %p1119_p7 }
 0x427   : > { %p1125_p12 = pnand %p1124_p11, %p1120_p8 }
 0x429   : > { %1128 = shalt.err (!%p1125_p12)
}
 0x42a   : > { %1041 = dma.vmem_to_hbm [thread:$0]  (%p1289_p5), %s1417_s19, 128, %s1415_s17, %s800_s10   ;;  %v796_v29 = vadd.f32 %v994_v27, %v791_v28 }
 0x42b   : > { %s1500_s12 = sshll.u32 %s1272_s9, 7  ;;  %s1501_s26 = sshll.u32 %s1422_s24, 4  ;;  %s832_s26 = int_to_ptr.vmem [resolvable:$true] %s1501_s26 }
 0x42c   : > { %s829_s0 = scalar_lea.hbm %s1494_s8, %s1500_s12  ;;  %798 = vst.msk [vmem:[%s1422_s24] sm:$0xff] %vm591_vm1, %v796_v29  ;;  %s805_s22 = scalar_lea.sflag [#allocation5], %s1400_s25 }
 0x42d   : > { %s1129_s13 = scalar_lea.vmem %s832_s26, 128  ;;  %s1205_s23 = smov [#allocation4]  }
 0x42e   : > { %p1130_p13 = scmp.ne.s32.totalorder %s832_s26, %s1129_s13  ;;  %s1133_s18 = sshll.u32 %s1205_s23, 4  ;;  %s1134_s18 = int_to_ptr.vmem [resolvable:$false] %s1133_s18 }
 0x42f   : > { %s1135_s19 = scalar_lea.vmem %s1134_s18, 256  ;;  %p1136_p2 = scmp.lt.s32.totalorder %s832_s26, %s1134_s18 }
 0x430   : > { %p1131_p0 = pnand %p1130_p13, %p1289_p5  ;;  %p1137_p3 = scmp.lt.s32.totalorder %s1135_s19, %s1129_s13 }
 0x432   : > { %p1132_p1 = pneg %p1131_p0  ;;  %p1138_p4 = por %p1137_p3, %p1136_p2 }
 0x434   : > { %p1139_p7 = pnand %p1138_p4, %p1132_p1 }
 0x436   : > { %1142 = shalt.err (!%p1139_p7)
}
 0x437   : > { %s1143_s9 = scalar_lea.hbm %s829_s0, 128  ;;  %s1147_s24 = scalar_lea.hbm %s1494_s8, 256 }
 0x438   : > { %p1144_p8 = scmp.ne.s32.totalorder %s829_s0, %s1143_s9  ;;  %p1148_p11 = scmp.lt.s32.totalorder %s829_s0, %s1494_s8 }
 0x439   : > { %p1149_p12 = scmp.lt.s32.totalorder %s1147_s24, %s1143_s9 }
 0x43a   : > { %p1145_p9 = pnand %p1144_p8, %p1289_p5 }
 0x43b   : > { %p1150_p13 = por %p1149_p12, %p1148_p11 }
 0x43c   : > { %p1146_p10 = pneg %p1145_p9 }
 0x43e   : > { %p1151_p0 = pnand %p1150_p13, %p1146_p10 }
 0x440   : > { %1154 = shalt.err (!%p1151_p0)
}
 0x441   : > { %1042 = dma.vmem_to_hbm [thread:$0]  (%p1289_p5), %s832_s26, 128, %s829_s0, %s805_s22  }
 0x442 PF: > { %p1052_p1 = scmp.ge.s32.totalorder %s1193_s30, 2  ;;  %s843_s20 = sand.u32 1, %s1181_s27  }
 0x443   : > { %s844_s21 = scalar_lea.sflag [#allocation3], %s843_s20 }
 0x444   : > { %p1046_p2 = pnand %p1052_p1, %p1293_p6 }
 0x446   : > { %p1047_p3 = pneg %p1046_p2 }
 0x448   : > { %1172 = dma.done.wait (%p1047_p3), %s844_s21, 128  }
 0x449   : > { %1174 = vsyncadd (%p1047_p3), %s844_s21, 4294967168  ;;  %s853_s13 = scalar_lea.sflag [#allocation5], %s843_s20 }
 0x44a   : > { %1176 = dma.done.wait (%p1047_p3), %s853_s13, 128  }
 0x44b   : > { %1178 = vsyncadd (%p1047_p3), %s853_s13, 4294967168  ;;  %p22_p5 = scmp.ge.s32.totalorder %s1276_s11, 4   ;;  %s1502_s27 = smov %s1185_s28 }
 0x44c   : > { %s1503_s28 = smov %s1189_s29  ;;  %s1504_s29 = smov %s1287_s14 }
 0x44d   : > { %s1505_s30 = smov %s1276_s11  ;;  %24 = sbr.rel (!%p22_p5) target bundleno = 7 (0x7), region = 112 }
 0x452   :  { %858 = vsyncpa [#allocation3], 1 }
 0x453   :  { %860 = vsyncpa [#allocation3 + $0x1], 1 }
 0x454   :  { %861 = vsyncpa [#allocation5], 1 }
 0x455   :  { %863 = vsyncpa [#allocation5 + $0x1], 1 }

</bundles_post_ra>
